<compile_context>
chip_gen: v5e
topology: v5e:2x2
jax: 0.10.0
libtpu: 0.0.40
codegen_flags: <defaults>
</compile_context>

<pallas_src>
import math
import functools

import jax
import jax.numpy as jnp
from jax.experimental import pallas as pl
from jax.experimental.pallas import tpu as pltpu


BOS_TOKEN = 1


# ----------------------------------------------------------------------------
# Fused Pallas kernel: full greedy decode, one grid step per caption position.
# ----------------------------------------------------------------------------
def fused_decode_kernel(
    feats_ref,    # [BP, L, F]  video features (resident)
    bos_emb_ref,  # [BP, E]     BOS embedding broadcast over batch (resident)
    emb_tbl_ref,  # [V, E]      embedding table (resident, for greedy feedback)
    wf_ref,       # [F, A]      attention: feature projection
    wh_ref,       # [H, A]      attention: hidden projection
    va_ref,       # [1, A]      attention: score vector
    we0_ref,      # [E, H]      IndRNN layer 0 input weight (embedding part)
    wc0_ref,      # [F, H]      IndRNN layer 0 input weight (context part)
    u0_ref,       # [1, H]      IndRNN layer 0 recurrent weight (elementwise)
    b0_ref,       # [1, H]
    wi1_ref,      # [H, H]      IndRNN layer 1 input weight
    u1_ref,       # [1, H]
    b1_ref,       # [1, H]
    wo_ref,       # [H, V]      output projection
    bo_ref,       # [1, V]
    logp_ref,     # [1, BP, V]  output tile for this time step
    h_scr,        # [2, BP, H]  VMEM scratch: carried hidden state
    emb_scr,      # [BP, E]     VMEM scratch: carried input embedding
    fproj_scr,    # [BP, L, A]  VMEM scratch: hoisted feats @ wf
):
    t = pl.program_id(0)
    BP, L, F = feats_ref.shape
    A = wf_ref.shape[1]

    # ---- step 0: init recurrent state / input token, hoist feats @ wf
    @pl.when(t == 0)
    def _init():
        h_scr[...] = jnp.zeros_like(h_scr)
        emb_scr[...] = bos_emb_ref[...]
        feats2d = feats_ref[...].reshape(BP * L, F)
        fproj_scr[...] = jnp.dot(
            feats2d, wf_ref[...], preferred_element_type=jnp.float32
        ).reshape(BP, L, A)

    feats = feats_ref[...]                                  # [BP, L, F]
    emb = emb_scr[...]                                      # [BP, E]
    h0 = h_scr[0]                                           # [BP, H]
    h1 = h_scr[1]                                           # [BP, H]

    # ---- additive attention over the L frames, keyed on the top hidden state
    hproj = jnp.dot(h1, wh_ref[...], preferred_element_type=jnp.float32)  # [BP, A]
    e = jnp.tanh(fproj_scr[...] + hproj[:, None, :])                      # [BP, L, A]
    scores = jnp.sum(e * va_ref[...][None, :, :], axis=-1)                # [BP, L]
    scores = scores - jnp.max(scores, axis=-1, keepdims=True)
    w = jnp.exp(scores)
    alpha = w * pl.reciprocal(jnp.sum(w, axis=-1, keepdims=True), approx=True)
    ctx = jnp.sum(alpha[:, :, None] * feats, axis=1)                      # [BP, F]

    # ---- IndRNN layer 0:  h = relu(We*emb + Wc*ctx + u ⊙ h_prev + b)
    pre0 = (jnp.dot(emb, we0_ref[...], preferred_element_type=jnp.float32)
            + jnp.dot(ctx, wc0_ref[...], preferred_element_type=jnp.float32)
            + u0_ref[...] * h0 + b0_ref[...])
    h0n = jnp.maximum(pre0, 0.0)

    # ---- IndRNN layer 1
    pre1 = (jnp.dot(h0n, wi1_ref[...], preferred_element_type=jnp.float32)
            + u1_ref[...] * h1 + b1_ref[...])
    h1n = jnp.maximum(pre1, 0.0)

    # ---- output projection + log-softmax over vocab
    logits = (jnp.dot(h1n, wo_ref[...], preferred_element_type=jnp.float32)
              + bo_ref[...])                                              # [BP, V]
    m = jnp.max(logits, axis=-1, keepdims=True)
    lse = jnp.log(jnp.sum(jnp.exp(logits - m), axis=-1, keepdims=True)) + m
    logp_ref[0] = logits - lse

    # ---- greedy feedback: one-hot(argmax) @ embedding table (MXU "gather")
    # TODO(synk): exact logit ties would sum the tied embeddings (measure-zero
    # for real-valued inputs; torch argmax picks the first).
    onehot = (logits == m).astype(jnp.float32)                            # [BP, V]
    emb_scr[...] = jnp.dot(onehot, emb_tbl_ref[...],
                           preferred_element_type=jnp.float32)            # [BP, E]

    # ---- carry hidden state in VMEM (never leaves the chip)
    h_scr[0] = h0n
    h_scr[1] = h1n


# ----------------------------------------------------------------------------
# Wrapper: one pallas_call for the whole greedy decode
# ----------------------------------------------------------------------------
def greedy_decode(params, feats, *, time_steps, bos_token=BOS_TOKEN):
    B, L, F = feats.shape
    E = params["embedding"].shape[1]
    H = params["u0"].shape[1]
    A = params["wf"].shape[1]
    V = params["wo"].shape[1]
    T = time_steps - 1

    # Pad batch to the f32 sublane tile (8): full vregs, no masked stores.
    BP = ((B + 7) // 8) * 8
    feats_p = jnp.zeros((BP, L, F), jnp.float32).at[:B].set(
        feats.astype(jnp.float32))
    bos_emb = jnp.broadcast_to(
        params["embedding"][bos_token].astype(jnp.float32), (BP, E))

    inputs = (
        feats_p, bos_emb, params["embedding"],
        params["wf"], params["wh"], params["va"],
        params["we0"], params["wc0"], params["u0"], params["b0"],
        params["wi1"], params["u1"], params["b1"],
        params["wo"], params["bo"],
    )

    def resident(x):
        # Whole array resident in VMEM; block index constant over the time
        # grid, so it is DMA'd once and never re-fetched.
        return pl.BlockSpec(x.shape, lambda t, n=x.ndim: (0,) * n)

    logp_all = pl.pallas_call(
        fused_decode_kernel,
        out_shape=jax.ShapeDtypeStruct((T, BP, V), jnp.float32),
        grid=(T,),
        in_specs=[resident(x) for x in inputs],
        out_specs=pl.BlockSpec((1, BP, V), lambda t: (t, 0, 0)),
        scratch_shapes=[
            pltpu.VMEM((2, BP, H), jnp.float32),   # carried hidden state
            pltpu.VMEM((BP, E), jnp.float32),      # carried input embedding
            pltpu.VMEM((BP, L, A), jnp.float32),   # hoisted feats @ wf
        ],
        compiler_params=pltpu.CompilerParams(
            dimension_semantics=("arbitrary",)),   # time recurrence: sequential
    )(*inputs)

    return logp_all[:, :B, :]   # drop batch padding


# ----------------------------------------------------------------------------
# Net.forward: greedy caption generation (teacher_forcing_ratio = 0.0)
# ----------------------------------------------------------------------------
@functools.partial(jax.jit, static_argnames=("time_steps",))
def net_forward(params, feats, time_steps):
    # outputs: [TIME_STEPS-1, B, V] per-step log-probabilities
    return greedy_decode(params, feats, time_steps=time_steps)


# ----------------------------------------------------------------------------
# Deterministic parameter construction
# ----------------------------------------------------------------------------
def init_params(key, *, F, E, H, A, V, recurrent_min, recurrent_max):
    ks = jax.random.split(key, 12)
    u = lambda k, shape, lo, hi: jax.random.uniform(
        k, shape, jnp.float32, minval=lo, maxval=hi)
    s = 0.1
    return {
        "embedding": u(ks[0], (V, E), -s, s),
        "wf": u(ks[1], (F, A), -s, s),
        "wh": u(ks[2], (H, A), -s, s),
        "va": u(ks[3], (1, A), -s, s),
        "we0": u(ks[4], (E, H), -s, s),
        "wc0": u(ks[5], (F, H), -s, s),
        # recurrent_inits: all-but-last layer U(0, RMAX), last layer U(RMIN, RMAX)
        "u0": u(ks[6], (1, H), 0.0, recurrent_max),
        "b0": jnp.zeros((1, H), jnp.float32),
        "wi1": u(ks[7], (H, H), -s, s),
        "u1": u(ks[8], (1, H), recurrent_min, recurrent_max),
        "b1": jnp.zeros((1, H), jnp.float32),
        "wo": u(ks[9], (H, V), -s, s),
        "bo": jnp.zeros((1, V), jnp.float32),
    }


if __name__ == "__main__":
    # Small config consistent with the module's __init__.
    B = 2                    # batch
    L = 8                    # C.loader.frame_sample_len
    F = 128                  # C.feat.size
    E = 64                   # C.vocab.embedding_size
    H = 64                   # C.decoder.rnn_hidden_size
    A = 64                   # C.decoder.rnn_attn_size
    V = 128                  # vocab.n_vocabs
    MAX_CAPTION_LEN = 8
    TIME_STEPS = MAX_CAPTION_LEN + 2
    RECURRENT_MAX = math.pow(2.0, 1.0 / TIME_STEPS)
    RECURRENT_MIN = math.pow(0.5, 1.0 / TIME_STEPS)

    key = jax.random.PRNGKey(0)
    k_param, k_feat = jax.random.split(key)
    params = init_params(k_param, F=F, E=E, H=H, A=A, V=V,
                         recurrent_min=RECURRENT_MIN,
                         recurrent_max=RECURRENT_MAX)

    feats = jax.random.normal(k_feat, (B, L, F), jnp.float32)

    outputs = net_forward(params, feats, time_steps=TIME_STEPS)
    outputs = jax.block_until_ready(outputs)

    assert outputs.shape == (TIME_STEPS - 1, B, V), outputs.shape
    assert bool(jnp.all(jnp.isfinite(outputs)))
    # log-softmax self-consistency: per-row probabilities sum to 1.
    probs_sum = jnp.sum(jnp.exp(outputs), axis=-1)
    assert bool(jnp.all(jnp.abs(probs_sum - 1.0) < 1e-3))
    print("KERNEL_OK")
</pallas_src>

<mosaic_0001>
module attributes {stable_mosaic.version = 11 : i64} {
  func.func @fused_decode_kernel(%arg0: i32, %arg1: memref<8x8x128xf32, #tpu.memory_space<vmem>>, %arg2: memref<8x64xf32, #tpu.memory_space<vmem>>, %arg3: memref<128x64xf32, #tpu.memory_space<vmem>>, %arg4: memref<128x64xf32, #tpu.memory_space<vmem>>, %arg5: memref<64x64xf32, #tpu.memory_space<vmem>>, %arg6: memref<1x64xf32, #tpu.memory_space<vmem>>, %arg7: memref<64x64xf32, #tpu.memory_space<vmem>>, %arg8: memref<128x64xf32, #tpu.memory_space<vmem>>, %arg9: memref<1x64xf32, #tpu.memory_space<vmem>>, %arg10: memref<1x64xf32, #tpu.memory_space<vmem>>, %arg11: memref<64x64xf32, #tpu.memory_space<vmem>>, %arg12: memref<1x64xf32, #tpu.memory_space<vmem>>, %arg13: memref<1x64xf32, #tpu.memory_space<vmem>>, %arg14: memref<64x128xf32, #tpu.memory_space<vmem>>, %arg15: memref<1x128xf32, #tpu.memory_space<vmem>>, %arg16: memref<1x8x128xf32, #tpu.memory_space<vmem>>, %arg17: memref<2x8x64xf32, #tpu.memory_space<vmem>>, %arg18: memref<8x64xf32, #tpu.memory_space<vmem>>, %arg19: memref<8x8x64xf32, #tpu.memory_space<vmem>>) attributes {dimension_semantics = [#tpu.dimension_semantics<arbitrary>], iteration_bounds = array<i64: 9>, scalar_prefetch = 0 : i64, scratch_operands = 3 : i64, tpu.core_type = #tpu.core_type<tc>, window_params = [{pipeline_mode = #tpu.pipeline_mode<synchronous>, transform_indices = @transform_0, window_bounds = array<i64: 8, 8, 128>}, {pipeline_mode = #tpu.pipeline_mode<synchronous>, transform_indices = @transform_1, window_bounds = array<i64: 8, 64>}, {pipeline_mode = #tpu.pipeline_mode<synchronous>, transform_indices = @transform_2, window_bounds = array<i64: 128, 64>}, {pipeline_mode = #tpu.pipeline_mode<synchronous>, transform_indices = @transform_3, window_bounds = array<i64: 128, 64>}, {pipeline_mode = #tpu.pipeline_mode<synchronous>, transform_indices = @transform_4, window_bounds = array<i64: 64, 64>}, {pipeline_mode = #tpu.pipeline_mode<synchronous>, transform_indices = @transform_5, window_bounds = array<i64: 1, 64>}, {pipeline_mode = #tpu.pipeline_mode<synchronous>, transform_indices = @transform_6, window_bounds = array<i64: 64, 64>}, {pipeline_mode = #tpu.pipeline_mode<synchronous>, transform_indices = @transform_7, window_bounds = array<i64: 128, 64>}, {pipeline_mode = #tpu.pipeline_mode<synchronous>, transform_indices = @transform_8, window_bounds = array<i64: 1, 64>}, {pipeline_mode = #tpu.pipeline_mode<synchronous>, transform_indices = @transform_9, window_bounds = array<i64: 1, 64>}, {pipeline_mode = #tpu.pipeline_mode<synchronous>, transform_indices = @transform_10, window_bounds = array<i64: 64, 64>}, {pipeline_mode = #tpu.pipeline_mode<synchronous>, transform_indices = @transform_11, window_bounds = array<i64: 1, 64>}, {pipeline_mode = #tpu.pipeline_mode<synchronous>, transform_indices = @transform_12, window_bounds = array<i64: 1, 64>}, {pipeline_mode = #tpu.pipeline_mode<synchronous>, transform_indices = @transform_13, window_bounds = array<i64: 64, 128>}, {pipeline_mode = #tpu.pipeline_mode<synchronous>, transform_indices = @transform_14, window_bounds = array<i64: 1, 128>}, {transform_indices = @transform_15, window_bounds = array<i64: 1, 8, 128>}]} {
    %c0_i32 = arith.constant 0 : i32
    %0 = arith.cmpi eq, %arg0, %c0_i32 : i32
    %1 = arith.extui %0 : i1 to i32
    %c0_i32_0 = arith.constant 0 : i32
    %2 = arith.cmpi ne, %1, %c0_i32_0 : i32
    scf.if %2 {
      %cst_61 = arith.constant 0.000000e+00 : f32
      %92 = vector.broadcast %cst_61 : f32 to vector<2x8x64xf32>
      %c0_62 = arith.constant 0 : index
      %c0_63 = arith.constant 0 : index
      %c0_64 = arith.constant 0 : index
      %93 = vector.load %arg17[%c0_62, %c0_63, %c0_64] : memref<2x8x64xf32, #tpu.memory_space<vmem>>, vector<2x8x64xf32>
      tpu.vector_store %arg17[%c0_62, %c0_63, %c0_64], %92 {strides = array<i32>} : memref<2x8x64xf32, #tpu.memory_space<vmem>>, vector<2x8x64xf32>,
      %c0_65 = arith.constant 0 : index
      %c0_66 = arith.constant 0 : index
      %94 = vector.load %arg2[%c0_65, %c0_66] : memref<8x64xf32, #tpu.memory_space<vmem>>, vector<8x64xf32>
      %c0_67 = arith.constant 0 : index
      %c0_68 = arith.constant 0 : index
      %95 = vector.load %arg18[%c0_67, %c0_68] : memref<8x64xf32, #tpu.memory_space<vmem>>, vector<8x64xf32>
      tpu.vector_store %arg18[%c0_67, %c0_68], %94 {strides = array<i32>} : memref<8x64xf32, #tpu.memory_space<vmem>>, vector<8x64xf32>,
      %c0_69 = arith.constant 0 : index
      %c0_70 = arith.constant 0 : index
      %c0_71 = arith.constant 0 : index
      %96 = vector.load %arg1[%c0_69, %c0_70, %c0_71] : memref<8x8x128xf32, #tpu.memory_space<vmem>>, vector<8x8x128xf32>
      %97 = vector.shape_cast %96 : vector<8x8x128xf32> to vector<64x128xf32>
      %c0_72 = arith.constant 0 : index
      %c0_73 = arith.constant 0 : index
      %98 = vector.load %arg4[%c0_72, %c0_73] : memref<128x64xf32, #tpu.memory_space<vmem>>, vector<128x64xf32>
      %cst_74 = arith.constant dense<0.000000e+00> : vector<64x64xf32>
      %99 = tpu.matmul %97, %98, %cst_74 {dimension_numbers = #tpu.dot_dimension_numbers<[1], [0], [0], [1], [0, 0, 1, 1], [], []>} : vector<64x128xf32>, vector<128x64xf32>, vector<64x64xf32> -> vector<64x64xf32>
      %100 = vector.shape_cast %99 : vector<64x64xf32> to vector<8x8x64xf32>
      %c0_75 = arith.constant 0 : index
      %c0_76 = arith.constant 0 : index
      %c0_77 = arith.constant 0 : index
      %101 = vector.load %arg19[%c0_75, %c0_76, %c0_77] : memref<8x8x64xf32, #tpu.memory_space<vmem>>, vector<8x8x64xf32>
      tpu.vector_store %arg19[%c0_75, %c0_76, %c0_77], %100 {strides = array<i32>} : memref<8x8x64xf32, #tpu.memory_space<vmem>>, vector<8x8x64xf32>,
    } else {
    }
    %c0 = arith.constant 0 : index
    %c0_1 = arith.constant 0 : index
    %c0_2 = arith.constant 0 : index
    %3 = vector.load %arg1[%c0, %c0_1, %c0_2] : memref<8x8x128xf32, #tpu.memory_space<vmem>>, vector<8x8x128xf32>
    %c0_3 = arith.constant 0 : index
    %c0_4 = arith.constant 0 : index
    %4 = vector.load %arg18[%c0_3, %c0_4] : memref<8x64xf32, #tpu.memory_space<vmem>>, vector<8x64xf32>
    %c0_5 = arith.constant 0 : index
    %c0_6 = arith.constant 0 : index
    %c0_7 = arith.constant 0 : index
    %5 = vector.load %arg17[%c0_5, %c0_6, %c0_7] : memref<2x8x64xf32, #tpu.memory_space<vmem>>, vector<1x8x64xf32>
    %6 = vector.shape_cast %5 : vector<1x8x64xf32> to vector<8x64xf32>
    %c1 = arith.constant 1 : index
    %c0_8 = arith.constant 0 : index
    %c0_9 = arith.constant 0 : index
    %7 = vector.load %arg17[%c1, %c0_8, %c0_9] : memref<2x8x64xf32, #tpu.memory_space<vmem>>, vector<1x8x64xf32>
    %8 = vector.shape_cast %7 : vector<1x8x64xf32> to vector<8x64xf32>
    %c0_10 = arith.constant 0 : index
    %c0_11 = arith.constant 0 : index
    %9 = vector.load %arg5[%c0_10, %c0_11] : memref<64x64xf32, #tpu.memory_space<vmem>>, vector<64x64xf32>
    %cst = arith.constant dense<0.000000e+00> : vector<8x64xf32>
    %10 = tpu.matmul %8, %9, %cst {dimension_numbers = #tpu.dot_dimension_numbers<[1], [0], [0], [1], [0, 0, 1, 1], [], []>} : vector<8x64xf32>, vector<64x64xf32>, vector<8x64xf32> -> vector<8x64xf32>
    %c0_12 = arith.constant 0 : index
    %c0_13 = arith.constant 0 : index
    %c0_14 = arith.constant 0 : index
    %11 = vector.load %arg19[%c0_12, %c0_13, %c0_14] : memref<8x8x64xf32, #tpu.memory_space<vmem>>, vector<8x8x64xf32>
    %12 = vector.shape_cast %10 : vector<8x64xf32> to vector<8x1x64xf32>
    %13 = vector.broadcast %12 : vector<8x1x64xf32> to vector<8x8x64xf32>
    %14 = arith.addf %11, %13 : vector<8x8x64xf32>
    %15 = math.tanh %14 : vector<8x8x64xf32>
    %c0_15 = arith.constant 0 : index
    %c0_16 = arith.constant 0 : index
    %16 = vector.load %arg6[%c0_15, %c0_16] : memref<1x64xf32, #tpu.memory_space<vmem>>, vector<1x64xf32>
    %17 = vector.shape_cast %16 : vector<1x64xf32> to vector<1x1x64xf32>
    %18 = vector.broadcast %17 : vector<1x1x64xf32> to vector<8x8x64xf32>
    %19 = arith.mulf %15, %18 : vector<8x8x64xf32>
    %cst_17 = arith.constant dense<0.000000e+00> : vector<8x8xf32>
    %20 = vector.multi_reduction <add>, %19, %cst_17 [2] : vector<8x8x64xf32> to vector<8x8xf32>
    %cst_18 = arith.constant dense<0xFF800000> : vector<8xf32>
    %21 = vector.multi_reduction <maximumf>, %20, %cst_18 [1] : vector<8x8xf32> to vector<8xf32>
    %22 = vector.shape_cast %21 : vector<8xf32> to vector<8x1xf32>
    %23 = vector.broadcast %22 : vector<8x1xf32> to vector<8x8xf32>
    %24 = arith.subf %20, %23 : vector<8x8xf32>
    %25 = math.exp %24 : vector<8x8xf32>
    %cst_19 = arith.constant dense<0.000000e+00> : vector<8xf32>
    %26 = vector.multi_reduction <add>, %25, %cst_19 [1] : vector<8x8xf32> to vector<8xf32>
    %27 = vector.shape_cast %26 : vector<8xf32> to vector<8x1xf32>
    %28 = tpu.reciprocal %27 {approx = true} : vector<8x1xf32> -> vector<8x1xf32>
    %29 = vector.broadcast %28 : vector<8x1xf32> to vector<8x8xf32>
    %30 = arith.mulf %25, %29 : vector<8x8xf32>
    %31 = vector.shape_cast %30 : vector<8x8xf32> to vector<8x8x1xf32>
    %32 = vector.broadcast %31 : vector<8x8x1xf32> to vector<8x8x128xf32>
    %33 = arith.mulf %32, %3 : vector<8x8x128xf32>
    %cst_20 = arith.constant dense<0.000000e+00> : vector<8x128xf32>
    %34 = vector.multi_reduction <add>, %33, %cst_20 [1] : vector<8x8x128xf32> to vector<8x128xf32>
    %c0_21 = arith.constant 0 : index
    %c0_22 = arith.constant 0 : index
    %35 = vector.load %arg7[%c0_21, %c0_22] : memref<64x64xf32, #tpu.memory_space<vmem>>, vector<64x64xf32>
    %cst_23 = arith.constant dense<0.000000e+00> : vector<8x64xf32>
    %36 = tpu.matmul %4, %35, %cst_23 {dimension_numbers = #tpu.dot_dimension_numbers<[1], [0], [0], [1], [0, 0, 1, 1], [], []>} : vector<8x64xf32>, vector<64x64xf32>, vector<8x64xf32> -> vector<8x64xf32>
    %c0_24 = arith.constant 0 : index
    %c0_25 = arith.constant 0 : index
    %37 = vector.load %arg8[%c0_24, %c0_25] : memref<128x64xf32, #tpu.memory_space<vmem>>, vector<128x64xf32>
    %cst_26 = arith.constant dense<0.000000e+00> : vector<8x64xf32>
    %38 = tpu.matmul %34, %37, %cst_26 {dimension_numbers = #tpu.dot_dimension_numbers<[1], [0], [0], [1], [0, 0, 1, 1], [], []>} : vector<8x128xf32>, vector<128x64xf32>, vector<8x64xf32> -> vector<8x64xf32>
    %39 = arith.addf %36, %38 : vector<8x64xf32>
    %c0_27 = arith.constant 0 : index
    %c0_28 = arith.constant 0 : index
    %40 = vector.load %arg9[%c0_27, %c0_28] : memref<1x64xf32, #tpu.memory_space<vmem>>, vector<1x64xf32>
    %41 = vector.broadcast %40 : vector<1x64xf32> to vector<8x64xf32>
    %42 = arith.mulf %41, %6 : vector<8x64xf32>
    %43 = arith.addf %39, %42 : vector<8x64xf32>
    %c0_29 = arith.constant 0 : index
    %c0_30 = arith.constant 0 : index
    %44 = vector.load %arg10[%c0_29, %c0_30] : memref<1x64xf32, #tpu.memory_space<vmem>>, vector<1x64xf32>
    %45 = vector.broadcast %44 : vector<1x64xf32> to vector<8x64xf32>
    %46 = arith.addf %43, %45 : vector<8x64xf32>
    %cst_31 = arith.constant 0.000000e+00 : f32
    %47 = vector.broadcast %cst_31 : f32 to vector<8x64xf32>
    %48 = arith.maximumf %46, %47 : vector<8x64xf32>
    %c0_32 = arith.constant 0 : index
    %c0_33 = arith.constant 0 : index
    %49 = vector.load %arg11[%c0_32, %c0_33] : memref<64x64xf32, #tpu.memory_space<vmem>>, vector<64x64xf32>
    %cst_34 = arith.constant dense<0.000000e+00> : vector<8x64xf32>
    %50 = tpu.matmul %48, %49, %cst_34 {dimension_numbers = #tpu.dot_dimension_numbers<[1], [0], [0], [1], [0, 0, 1, 1], [], []>} : vector<8x64xf32>, vector<64x64xf32>, vector<8x64xf32> -> vector<8x64xf32>
    %c0_35 = arith.constant 0 : index
    %c0_36 = arith.constant 0 : index
    %51 = vector.load %arg12[%c0_35, %c0_36] : memref<1x64xf32, #tpu.memory_space<vmem>>, vector<1x64xf32>
    %52 = vector.broadcast %51 : vector<1x64xf32> to vector<8x64xf32>
    %53 = arith.mulf %52, %8 : vector<8x64xf32>
    %54 = arith.addf %50, %53 : vector<8x64xf32>
    %c0_37 = arith.constant 0 : index
    %c0_38 = arith.constant 0 : index
    %55 = vector.load %arg13[%c0_37, %c0_38] : memref<1x64xf32, #tpu.memory_space<vmem>>, vector<1x64xf32>
    %56 = vector.broadcast %55 : vector<1x64xf32> to vector<8x64xf32>
    %57 = arith.addf %54, %56 : vector<8x64xf32>
    %cst_39 = arith.constant 0.000000e+00 : f32
    %58 = vector.broadcast %cst_39 : f32 to vector<8x64xf32>
    %59 = arith.maximumf %57, %58 : vector<8x64xf32>
    %c0_40 = arith.constant 0 : index
    %c0_41 = arith.constant 0 : index
    %60 = vector.load %arg14[%c0_40, %c0_41] : memref<64x128xf32, #tpu.memory_space<vmem>>, vector<64x128xf32>
    %cst_42 = arith.constant dense<0.000000e+00> : vector<8x128xf32>
    %61 = tpu.matmul %59, %60, %cst_42 {dimension_numbers = #tpu.dot_dimension_numbers<[1], [0], [0], [1], [0, 0, 1, 1], [], []>} : vector<8x64xf32>, vector<64x128xf32>, vector<8x128xf32> -> vector<8x128xf32>
    %c0_43 = arith.constant 0 : index
    %c0_44 = arith.constant 0 : index
    %62 = vector.load %arg15[%c0_43, %c0_44] : memref<1x128xf32, #tpu.memory_space<vmem>>, vector<1x128xf32>
    %63 = vector.broadcast %62 : vector<1x128xf32> to vector<8x128xf32>
    %64 = arith.addf %61, %63 : vector<8x128xf32>
    %cst_45 = arith.constant dense<0xFF800000> : vector<8xf32>
    %65 = vector.multi_reduction <maximumf>, %64, %cst_45 [1] : vector<8x128xf32> to vector<8xf32>
    %66 = vector.shape_cast %65 : vector<8xf32> to vector<8x1xf32>
    %67 = vector.broadcast %66 : vector<8x1xf32> to vector<8x128xf32>
    %68 = arith.subf %64, %67 : vector<8x128xf32>
    %69 = math.exp %68 : vector<8x128xf32>
    %cst_46 = arith.constant dense<0.000000e+00> : vector<8xf32>
    %70 = vector.multi_reduction <add>, %69, %cst_46 [1] : vector<8x128xf32> to vector<8xf32>
    %71 = vector.shape_cast %70 : vector<8xf32> to vector<8x1xf32>
    %72 = math.log %71 : vector<8x1xf32>
    %73 = arith.addf %72, %66 : vector<8x1xf32>
    %74 = vector.broadcast %73 : vector<8x1xf32> to vector<8x128xf32>
    %75 = arith.subf %64, %74 : vector<8x128xf32>
    %c0_47 = arith.constant 0 : index
    %c0_48 = arith.constant 0 : index
    %c0_49 = arith.constant 0 : index
    %76 = vector.load %arg16[%c0_47, %c0_48, %c0_49] : memref<1x8x128xf32, #tpu.memory_space<vmem>>, vector<1x8x128xf32>
    %77 = vector.shape_cast %76 : vector<1x8x128xf32> to vector<8x128xf32>
    %78 = vector.shape_cast %75 : vector<8x128xf32> to vector<1x8x128xf32>
    tpu.vector_store %arg16[%c0_47, %c0_48, %c0_49], %78 {strides = array<i32>} : memref<1x8x128xf32, #tpu.memory_space<vmem>>, vector<1x8x128xf32>,
    %79 = vector.broadcast %66 : vector<8x1xf32> to vector<8x128xf32>
    %80 = arith.cmpf oeq, %64, %79 : vector<8x128xf32>
    %81 = arith.extui %80 : vector<8x128xi1> to vector<8x128xi32>
    %82 = arith.sitofp %81 : vector<8x128xi32> to vector<8x128xf32>
    %c0_50 = arith.constant 0 : index
    %c0_51 = arith.constant 0 : index
    %83 = vector.load %arg3[%c0_50, %c0_51] : memref<128x64xf32, #tpu.memory_space<vmem>>, vector<128x64xf32>
    %cst_52 = arith.constant dense<0.000000e+00> : vector<8x64xf32>
    %84 = tpu.matmul %82, %83, %cst_52 {dimension_numbers = #tpu.dot_dimension_numbers<[1], [0], [0], [1], [0, 0, 1, 1], [], []>} : vector<8x128xf32>, vector<128x64xf32>, vector<8x64xf32> -> vector<8x64xf32>
    %c0_53 = arith.constant 0 : index
    %c0_54 = arith.constant 0 : index
    %85 = vector.load %arg18[%c0_53, %c0_54] : memref<8x64xf32, #tpu.memory_space<vmem>>, vector<8x64xf32>
    tpu.vector_store %arg18[%c0_53, %c0_54], %84 {strides = array<i32>} : memref<8x64xf32, #tpu.memory_space<vmem>>, vector<8x64xf32>,
    %c0_55 = arith.constant 0 : index
    %c0_56 = arith.constant 0 : index
    %c0_57 = arith.constant 0 : index
    %86 = vector.load %arg17[%c0_55, %c0_56, %c0_57] : memref<2x8x64xf32, #tpu.memory_space<vmem>>, vector<1x8x64xf32>
    %87 = vector.shape_cast %86 : vector<1x8x64xf32> to vector<8x64xf32>
    %88 = vector.shape_cast %48 : vector<8x64xf32> to vector<1x8x64xf32>
    tpu.vector_store %arg17[%c0_55, %c0_56, %c0_57], %88 {strides = array<i32>} : memref<2x8x64xf32, #tpu.memory_space<vmem>>, vector<1x8x64xf32>,
    %c1_58 = arith.constant 1 : index
    %c0_59 = arith.constant 0 : index
    %c0_60 = arith.constant 0 : index
    %89 = vector.load %arg17[%c1_58, %c0_59, %c0_60] : memref<2x8x64xf32, #tpu.memory_space<vmem>>, vector<1x8x64xf32>
    %90 = vector.shape_cast %89 : vector<1x8x64xf32> to vector<8x64xf32>
    %91 = vector.shape_cast %59 : vector<8x64xf32> to vector<1x8x64xf32>
    tpu.vector_store %arg17[%c1_58, %c0_59, %c0_60], %91 {strides = array<i32>} : memref<2x8x64xf32, #tpu.memory_space<vmem>>, vector<1x8x64xf32>,
    return
  }
  func.func @transform_0(%arg0: i32) -> (i32, i32, i32) {
    %c0_i32 = arith.constant 0 : i32
    %c0_i32_0 = arith.constant 0 : i32
    %c0_i32_1 = arith.constant 0 : i32
    %c0_i32_2 = arith.constant 0 : i32
    return %c0_i32, %c0_i32_0, %c0_i32_1 : i32, i32, i32
  }
  func.func @transform_1(%arg0: i32) -> (i32, i32) {
    %c0_i32 = arith.constant 0 : i32
    %c0_i32_0 = arith.constant 0 : i32
    %c0_i32_1 = arith.constant 0 : i32
    return %c0_i32, %c0_i32_0 : i32, i32
  }
  func.func @transform_2(%arg0: i32) -> (i32, i32) {
    %c0_i32 = arith.constant 0 : i32
    %c0_i32_0 = arith.constant 0 : i32
    %c0_i32_1 = arith.constant 0 : i32
    return %c0_i32, %c0_i32_0 : i32, i32
  }
  func.func @transform_3(%arg0: i32) -> (i32, i32) {
    %c0_i32 = arith.constant 0 : i32
    %c0_i32_0 = arith.constant 0 : i32
    %c0_i32_1 = arith.constant 0 : i32
    return %c0_i32, %c0_i32_0 : i32, i32
  }
  func.func @transform_4(%arg0: i32) -> (i32, i32) {
    %c0_i32 = arith.constant 0 : i32
    %c0_i32_0 = arith.constant 0 : i32
    %c0_i32_1 = arith.constant 0 : i32
    return %c0_i32, %c0_i32_0 : i32, i32
  }
  func.func @transform_5(%arg0: i32) -> (i32, i32) {
    %c0_i32 = arith.constant 0 : i32
    %c0_i32_0 = arith.constant 0 : i32
    %c0_i32_1 = arith.constant 0 : i32
    return %c0_i32, %c0_i32_0 : i32, i32
  }
  func.func @transform_6(%arg0: i32) -> (i32, i32) {
    %c0_i32 = arith.constant 0 : i32
    %c0_i32_0 = arith.constant 0 : i32
    %c0_i32_1 = arith.constant 0 : i32
    return %c0_i32, %c0_i32_0 : i32, i32
  }
  func.func @transform_7(%arg0: i32) -> (i32, i32) {
    %c0_i32 = arith.constant 0 : i32
    %c0_i32_0 = arith.constant 0 : i32
    %c0_i32_1 = arith.constant 0 : i32
    return %c0_i32, %c0_i32_0 : i32, i32
  }
  func.func @transform_8(%arg0: i32) -> (i32, i32) {
    %c0_i32 = arith.constant 0 : i32
    %c0_i32_0 = arith.constant 0 : i32
    %c0_i32_1 = arith.constant 0 : i32
    return %c0_i32, %c0_i32_0 : i32, i32
  }
  func.func @transform_9(%arg0: i32) -> (i32, i32) {
    %c0_i32 = arith.constant 0 : i32
    %c0_i32_0 = arith.constant 0 : i32
    %c0_i32_1 = arith.constant 0 : i32
    return %c0_i32, %c0_i32_0 : i32, i32
  }
  func.func @transform_10(%arg0: i32) -> (i32, i32) {
    %c0_i32 = arith.constant 0 : i32
    %c0_i32_0 = arith.constant 0 : i32
    %c0_i32_1 = arith.constant 0 : i32
    return %c0_i32, %c0_i32_0 : i32, i32
  }
  func.func @transform_11(%arg0: i32) -> (i32, i32) {
    %c0_i32 = arith.constant 0 : i32
    %c0_i32_0 = arith.constant 0 : i32
    %c0_i32_1 = arith.constant 0 : i32
    return %c0_i32, %c0_i32_0 : i32, i32
  }
  func.func @transform_12(%arg0: i32) -> (i32, i32) {
    %c0_i32 = arith.constant 0 : i32
    %c0_i32_0 = arith.constant 0 : i32
    %c0_i32_1 = arith.constant 0 : i32
    return %c0_i32, %c0_i32_0 : i32, i32
  }
  func.func @transform_13(%arg0: i32) -> (i32, i32) {
    %c0_i32 = arith.constant 0 : i32
    %c0_i32_0 = arith.constant 0 : i32
    %c0_i32_1 = arith.constant 0 : i32
    return %c0_i32, %c0_i32_0 : i32, i32
  }
  func.func @transform_14(%arg0: i32) -> (i32, i32) {
    %c0_i32 = arith.constant 0 : i32
    %c0_i32_0 = arith.constant 0 : i32
    %c0_i32_1 = arith.constant 0 : i32
    return %c0_i32, %c0_i32_0 : i32, i32
  }
  func.func @transform_15(%arg0: i32) -> (i32, i32, i32) {
    %c0_i32 = arith.constant 0 : i32
    %c0_i32_0 = arith.constant 0 : i32
    %c0_i32_1 = arith.constant 0 : i32
    return %arg0, %c0_i32, %c0_i32_0 : i32, i32, i32
  }
}

</mosaic_0001>

<bundles_post_ra>
// kernel: net_forward.1
= control target key start
LH: loop header
LB: loop body
LE: loop exit
PB: predicated region body
PF: predicated region fallthrough
CT: control target
= control target key end

     0   :  { %s1412_s18 = smov 0   ;;  %s1813_s0 = inlined_call_operand.vmem [shape: f32[8,8,128], index: 0, kind: input, shape index: {}]   ;;  %s1814_s1 = inlined_call_operand.vmem [shape: f32[8,64], index: 1, kind: input, shape index: {}]   ;;  %s1815_s2 = inlined_call_operand.vmem [shape: f32[128,64], index: 2, kind: input, shape index: {}]   ;;  %s1816_s3 = inlined_call_operand.vmem [shape: f32[128,64], index: 3, kind: input, shape index: {}]   ;;  %s1817_s4 = inlined_call_operand.vmem [shape: f32[64,64], index: 4, kind: input, shape index: {}]   ;;  %s1818_s5 = inlined_call_operand.vmem [shape: f32[1,64], index: 5, kind: input, shape index: {}]   ;;  %s1819_s6 = inlined_call_operand.vmem [shape: f32[64,64], index: 6, kind: input, shape index: {}]   ;;  %s1820_s7 = inlined_call_operand.vmem [shape: f32[128,64], index: 7, kind: input, shape index: {}]   ;;  %s1821_s8 = inlined_call_operand.vmem [shape: f32[1,64], index: 8, kind: input, shape index: {}]   ;;  %s1822_s9 = inlined_call_operand.vmem [shape: f32[1,64], index: 9, kind: input, shape index: {}]   ;;  %s1823_s10 = inlined_call_operand.vmem [shape: f32[64,64], index: 10, kind: input, shape index: {}]   ;;  %s1824_s11 = inlined_call_operand.vmem [shape: f32[1,64], index: 11, kind: input, shape index: {}]   ;;  %s1825_s12 = inlined_call_operand.vmem [shape: f32[1,64], index: 12, kind: input, shape index: {}]   ;;  %s1826_s13 = inlined_call_operand.vmem [shape: f32[64,128], index: 13, kind: input, shape index: {}]   ;;  %s1827_s14 = inlined_call_operand.vmem [shape: f32[1,128], index: 14, kind: input, shape index: {}]   ;;  %s1828_s15 = inlined_call_operand.vmem [shape: f32[9,8,128], index: 15, kind: output, shape index: {}]  }
   0x1 LB: > { %s1201_s19 = sadd.s32 4294967295, %s1327_s18   ;;  %p1204_p0 = scmp.ge.s32.totalorder %s1327_s18, 1  ;;  %s1327_s18 = sphi %s1412_s18, %s25_s18  }
   0x2   : > { %p427_p1 = scmp.lt.s32.totalorder %s1327_s18, 10 }
   0x4   : > { %p428_p2 = pnand %p1204_p0, %p427_p1 }
   0x5   : > { %p469_p3 = scmp.lt.s32.totalorder (!%p428_p2), %s1201_s19, 8  ;;  %p1206_p4 = scmp.ne.s32.totalorder (!%p428_p2), %s1201_s19, 0 }
   0x6   : > { %431 = sbr.rel (%p428_p2) target bundleno = 1691 (0x69b), region = 80 }
   0xb   : > { %s470_s20 = scalar_select %p469_p3, %s1201_s19, 8 }
   0xc   : > { %476 = sbr.rel (%p1206_p4) target bundleno = 191 (0xbf), region = 84 }
   0xd   : > { %s1205_s21 = sshll.u32 %s470_s20, 3 }
   0xe   : > { %s1423_s24 = scalar_lea.vmem %s1828_s15, %s1205_s21 }
  0x11   : > { %v505_v0 = vld [vmem:[%s1816_s3 + $0x78] sm:$0xff]  ;;  %v504_v1 = vld [vmem:[%s1816_s3 + $0x70] sm:$0xff]  ;;  %v503_v2 = vld [vmem:[%s1816_s3 + $0x68] sm:$0xff]  ;;  %vm477_vm0 = vcmask 523264   ;;  %v1329_v8 = vmov 0.0  }
  0x12   : > { %1216 = vmatpush.msra.mxu2 %v505_v0  ;;  %1217 = vmatpush.msra.mxu3 %v505_v0  ;;  %v502_v3 = vld [vmem:[%s1816_s3 + $0x60] sm:$0xff]  ;;  %v501_v4 = vld [vmem:[%s1816_s3 + $0x58] sm:$0xff]  ;;  %v500_v5 = vld [vmem:[%s1816_s3 + $0x50] sm:$0xff]  ;;  %478 = vst.msk [vmem:[#allocation2] sm:$0xff] %vm477_vm0, %v1329_v8 }
  0x13   : > { %506 = vmatpush.msra.mxu0 %v505_v0  ;;  %1215 = vmatpush.msra.mxu1 %v505_v0  ;;  %v499_v6 = vld [vmem:[%s1816_s3 + $0x48] sm:$0xff]  ;;  %v480_v7 = vld [vmem:[%s1814_s1] sm:$0xff]  ;;  %479 = vst.msk [vmem:[#allocation2 + $0x8] sm:$0xff] %vm477_vm0, %v1329_v8  ;;  %v497_v10 = vld [vmem:[%s1816_s3 + $0x38] sm:$0xff] }
  0x14   : > { %1219 = vmatpush.msra.mxu2 %v504_v1  ;;  %1220 = vmatpush.msra.mxu3 %v504_v1  ;;  %v498_v9 = vld [vmem:[%s1816_s3 + $0x40] sm:$0xff]  ;;  %481 = vst.msk [vmem:[#allocation3] sm:$0xff] %vm477_vm0, %v480_v7  ;;  %v496_v11 = vld [vmem:[%s1816_s3 + $0x30] sm:$0xff]  ;;  %v495_v12 = vld [vmem:[%s1816_s3 + $0x28] sm:$0xff] }
  0x15   : > { %507 = vmatpush.msra.mxu0 %v504_v1  ;;  %1218 = vmatpush.msra.mxu1 %v504_v1  ;;  %v494_v13 = vld [vmem:[%s1816_s3 + $0x20] sm:$0xff]  ;;  %v493_v14 = vld [vmem:[%s1816_s3 + $0x18] sm:$0xff]  ;;  %v492_v15 = vld [vmem:[%s1816_s3 + $0x10] sm:$0xff] }
  0x16   : > { %1222 = vmatpush.msra.mxu2 %v503_v2  ;;  %1223 = vmatpush.msra.mxu3 %v503_v2  ;;  %v491_v16 = vld [vmem:[%s1816_s3 + $0x8] sm:$0xff]  ;;  %v490_v17 = vld [vmem:[%s1816_s3] sm:$0xff]  ;;  %v488_v19 = vld [vmem:[%s1813_s0 + $0x30] sm:$0xff] }
  0x17   : > { %508 = vmatpush.msra.mxu0 %v503_v2  ;;  %1221 = vmatpush.msra.mxu1 %v503_v2  ;;  %v486_v18 = vld [vmem:[%s1813_s0 + $0x20] sm:$0xff]  ;;  %v484_v21 = vld [vmem:[%s1813_s0 + $0x10] sm:$0xff]  ;;  %v487_v22 = vld [vmem:[%s1813_s0 + $0x28] sm:$0xff] }
  0x18   : > { %1225 = vmatpush.msra.mxu2 %v502_v3  ;;  %1226 = vmatpush.msra.mxu3 %v502_v3  ;;  %v482_v20 = vld [vmem:[%s1813_s0] sm:$0xff]  ;;  %v489_v23 = vld [vmem:[%s1813_s0 + $0x38] sm:$0xff]  ;;  %v483_v24 = vld [vmem:[%s1813_s0 + $0x8] sm:$0xff] }
  0x19   : > { %509 = vmatpush.msra.mxu0 %v502_v3  ;;  %1224 = vmatpush.msra.mxu1 %v502_v3  ;;  %v485_v25 = vld [vmem:[%s1813_s0 + $0x18] sm:$0xff] }
  0x1a   : > { %1228 = vmatpush.msra.mxu2 %v501_v4  ;;  %1229 = vmatpush.msra.mxu3 %v501_v4 }
  0x1b   : > { %510 = vmatpush.msra.mxu0 %v501_v4  ;;  %1227 = vmatpush.msra.mxu1 %v501_v4 }
  0x1c   : > { %1231 = vmatpush.msra.mxu2 %v500_v5  ;;  %1232 = vmatpush.msra.mxu3 %v500_v5 }
  0x1d   : > { %511 = vmatpush.msra.mxu0 %v500_v5  ;;  %1230 = vmatpush.msra.mxu1 %v500_v5 }
  0x1e   : > { %1234 = vmatpush.msra.mxu2 %v499_v6  ;;  %1235 = vmatpush.msra.mxu3 %v499_v6 }
  0x1f   : > { %512 = vmatpush.msra.mxu0 %v499_v6  ;;  %1233 = vmatpush.msra.mxu1 %v499_v6 }
  0x20   : > { %1237 = vmatpush.msra.mxu2 %v498_v9  ;;  %1238 = vmatpush.msra.mxu3 %v498_v9 }
  0x21   : > { %513 = vmatpush.msra.mxu0 %v498_v9  ;;  %1236 = vmatpush.msra.mxu1 %v498_v9 }
  0x22   : > { %1240 = vmatpush.msra.mxu2 %v497_v10  ;;  %1241 = vmatpush.msra.mxu3 %v497_v10 }
  0x23   : > { %514 = vmatpush.msra.mxu0 %v497_v10  ;;  %1239 = vmatpush.msra.mxu1 %v497_v10 }
  0x24   : > { %1243 = vmatpush.msra.mxu2 %v496_v11  ;;  %1244 = vmatpush.msra.mxu3 %v496_v11 }
  0x25   : > { %515 = vmatpush.msra.mxu0 %v496_v11  ;;  %1242 = vmatpush.msra.mxu1 %v496_v11 }
  0x26   : > { %1246 = vmatpush.msra.mxu2 %v495_v12  ;;  %1247 = vmatpush.msra.mxu3 %v495_v12 }
  0x27   : > { %516 = vmatpush.msra.mxu0 %v495_v12  ;;  %1245 = vmatpush.msra.mxu1 %v495_v12 }
  0x28   : > { %1249 = vmatpush.msra.mxu2 %v494_v13  ;;  %1250 = vmatpush.msra.mxu3 %v494_v13 }
  0x29   : > { %517 = vmatpush.msra.mxu0 %v494_v13  ;;  %1248 = vmatpush.msra.mxu1 %v494_v13 }
  0x2a   : > { %1252 = vmatpush.msra.mxu2 %v493_v14  ;;  %1253 = vmatpush.msra.mxu3 %v493_v14 }
  0x2b   : > { %518 = vmatpush.msra.mxu0 %v493_v14  ;;  %1251 = vmatpush.msra.mxu1 %v493_v14 }
  0x2c   : > { %1255 = vmatpush.msra.mxu2 %v492_v15  ;;  %1256 = vmatpush.msra.mxu3 %v492_v15 }
  0x2d   : > { %519 = vmatpush.msra.mxu0 %v492_v15  ;;  %1254 = vmatpush.msra.mxu1 %v492_v15 }
  0x2e   : > { %1258 = vmatpush.msra.mxu2 %v491_v16  ;;  %1259 = vmatpush.msra.mxu3 %v491_v16 }
  0x2f   : > { %520 = vmatpush.msra.mxu0 %v491_v16  ;;  %1257 = vmatpush.msra.mxu1 %v491_v16 }
  0x30   : > { %1261 = vmatpush.msra.mxu2 %v490_v17  ;;  %1262 = vmatpush.msra.mxu3 %v490_v17 }
  0x31   : > { %534 = vmatmul.f32.vlgmr.msra.gmra.mxu2 %v486_v18  ;;  %540 = vmatmul.f32.vlgmr.msra.gmra.mxu3 %v488_v19 }
  0x32   : > { %521 = vmatpush.msra.mxu0 %v490_v17  ;;  %1260 = vmatpush.msra.mxu1 %v490_v17 }
  0x33   : > { %522 = vmatmul.f32.vlgmr.msra.gmra.mxu0 %v482_v20  ;;  %528 = vmatmul.f32.vlgmr.msra.gmra.mxu1 %v484_v21 }
  0x39   : > { %537 = vmatmul.f32.gmra.mxu2 %v487_v22  ;;  %543 = vmatmul.f32.gmra.mxu3 %v489_v23 }
  0x3b   : > { %525 = vmatmul.f32.gmra.mxu0 %v483_v24  ;;  %531 = vmatmul.f32.gmra.mxu1 %v485_v25 }
  0xb0   : > { %v523_v26 = vpop.f32.mrf.mxu0  ;;  %v529_v27 = vpop.f32.mrf.mxu1 }
  0xb1   : > { %547 = vst.msk [vmem:[#allocation4] sm:$0xff] %vm477_vm0, %v523_v26 }
  0xb2   : > { %549 = vst.msk [vmem:[#allocation4 + $0x10] sm:$0xff] %vm477_vm0, %v529_v27 }
  0xb4   : > { %v535_v28 = vpop.f32.mrf.mxu2  ;;  %v541_v29 = vpop.f32.mrf.mxu3 }
  0xb5   : > { %551 = vst.msk [vmem:[#allocation4 + $0x20] sm:$0xff] %vm477_vm0, %v535_v28 }
  0xb6   : > { %553 = vst.msk [vmem:[#allocation4 + $0x30] sm:$0xff] %vm477_vm0, %v541_v29 }
  0xb8   : > { %v526_v30 = vpop.f32.mrf.mxu0  ;;  %v532_v31 = vpop.f32.mrf.mxu1 }
  0xb9   : > { %548 = vst.msk [vmem:[#allocation4 + $0x8] sm:$0xff] %vm477_vm0, %v526_v30 }
  0xba   : > { %550 = vst.msk [vmem:[#allocation4 + $0x18] sm:$0xff] %vm477_vm0, %v532_v31 }
  0xbc   : > { %v538_v32 = vpop.f32.mrf.mxu2  ;;  %v544_v33 = vpop.f32.mrf.mxu3 }
  0xbd   : > { %552 = vst.msk [vmem:[#allocation4 + $0x28] sm:$0xff] %vm477_vm0, %v538_v32 }
  0xbe   : > { %554 = vst.msk [vmem:[#allocation4 + $0x38] sm:$0xff] %vm477_vm0, %v544_v33 }
  0xbf PF: > { %v574_v34 = vld [vmem:[%s1817_s4 + $0x38] sm:$0xff]  ;;  %v573_v35 = vld [vmem:[%s1817_s4 + $0x30] sm:$0xff]  ;;  %v572_v36 = vld [vmem:[%s1817_s4 + $0x28] sm:$0xff]  ;;  %vm575_vm1 = vcmask 523264   ;;  %vm701_vm2 = vcmask 1041409   ;;  %vm703_vm3 = vcmask 1042434  }
  0xc0   : > { %587 = vmatpush.msra.mxu0 %v574_v34  ;;  %v571_v37 = vld [vmem:[%s1817_s4 + $0x20] sm:$0xff]  ;;  %v570_v38 = vld [vmem:[%s1817_s4 + $0x18] sm:$0xff]  ;;  %v569_v39 = vld [vmem:[%s1817_s4 + $0x10] sm:$0xff]  ;;  %vm705_vm4 = vcmask 1043459   ;;  %vm707_vm5 = vcmask 1044484   ;;  %vm709_vm6 = vcmask 1045509  }
  0xc1   : > { %v568_v40 = vld [vmem:[%s1817_s4 + $0x8] sm:$0xff]  ;;  %v567_v41 = vld [vmem:[%s1817_s4] sm:$0xff]  ;;  %v599_v44 = vld [vmem:[#allocation4] sm:$0xff]  ;;  %vm711_vm7 = vcmask 1046534   ;;  %vm713_vm8 = vcmask 1047559   ;;  %vm716_vm9 = vcmask 64512  }
  0xc2   : > { %588 = vmatpush.msra.mxu0 %v573_v35  ;;  %v1535_v42 = vld [vmem:[#allocation2 + $0x8] sm:$0xff]  ;;  %v603_v49 = vld [vmem:[#allocation4 + $0x20] sm:$0xff]  ;;  %v600_v51 = vld [vmem:[#allocation4 + $0x8] sm:$0xff] }
  0xc3   : > { %v601_v50 = vld [vmem:[#allocation4 + $0x10] sm:$0xff]  ;;  %v602_v1 = vld [vmem:[#allocation4 + $0x18] sm:$0xff]  ;;  %v1277_v3 = vld [vmem:[%s1818_s5] ss:$0 sm:$0xff] }
  0xc4   : > { %589 = vmatpush.msra.mxu0 %v572_v36  ;;  %v604_v58 = vld [vmem:[#allocation4 + $0x28] sm:$0xff]  ;;  %v605_v7 = vld [vmem:[#allocation4 + $0x30] sm:$0xff] }
  0xc5   : > { %v606_v13 = vld [vmem:[#allocation4 + $0x38] sm:$0xff] }
  0xc6   : > { %590 = vmatpush.msra.mxu0 %v571_v37  ;;  %v691_v37 = vlaneseq }
  0xc8   : > { %591 = vmatpush.msra.mxu0 %v570_v38 }
  0xca   : > { %592 = vmatpush.msra.mxu0 %v569_v39 }
  0xcc   : > { %593 = vmatpush.msra.mxu0 %v568_v40  ;;  %v1550_v40 = vand.u32 127, %v691_v37 }
  0xce   : > { %594 = vmatpush.msra.mxu0 %v567_v41 }
  0xcf   : > { %1207 = vmatmul.msk.f32.vlgmr.msra.gmra.mxu0 %vm575_vm1, %v1535_v42 }
 0x14c   : > { %v596_v43 = vpop.f32.mrf.mxu0 }
 0x14d   : > { %v615_v45 = vperm.slane %v596_v43, 0  ;;  %v611_v46 = vrot.slane %v596_v43, 4  ;;  %v609_v47 = vrot.slane %v596_v43, 2  ;;  %v608_v48 = vrot.slane %v596_v43, 1 }
 0x14e   : > { %v612_v52 = vrot.slane %v596_v43, 5  ;;  %v610_v53 = vrot.slane %v596_v43, 3  ;;  %v613_v61 = vrot.slane %v596_v43, 6  ;;  %v614_v5 = vrot.slane %v596_v43, 7 }
 0x14f   : > { %v631_v54 = vadd.f32 %v615_v45, %v599_v44  ;;  %v619_v55 = vperm.slane %v611_v46, 0  ;;  %v617_v56 = vperm.slane %v609_v47, 0  ;;  %v616_v57 = vperm.slane %v608_v48, 0 }
 0x150   : > { %v620_v59 = vperm.slane %v612_v52, 0  ;;  %v618_v60 = vperm.slane %v610_v53, 0  ;;  %v621_v6 = vperm.slane %v613_v61, 0  ;;  %v622_v10 = vperm.slane %v614_v5, 0 }
 0x151   : > { %1283 = vtanh.f32 %v631_v54  ;;  %v635_v62 = vadd.f32 %v619_v55, %v603_v49  ;;  %v633_v63 = vadd.f32 %v617_v56, %v601_v50  ;;  %v632_v0 = vadd.f32 %v616_v57, %v600_v51 }
 0x152   : > { %v636_v2 = vadd.f32 %v620_v59, %v604_v58  ;;  %v634_v4 = vadd.f32 %v618_v60, %v602_v1  ;;  %v637_v12 = vadd.f32 %v621_v6, %v605_v7  ;;  %v638_v20 = vadd.f32 %v622_v10, %v606_v13 }
 0x153   : > { %1285 = vtanh.f32 %v635_v62 }
 0x154   : > { %1287 = vtanh.f32 %v633_v63  ;;  %v1330_v63 = vmov 0  }
 0x155   : > { %1289 = vtanh.f32 %v632_v0  ;;  %1276 = vset.pattern.permute.xlu2 %v1330_v63  ;;  %1275 = vset.pattern.permute.xlu1 %v1330_v63 }
 0x156   : > { %1291 = vtanh.f32 %v636_v2  ;;  %1274 = vset.pattern.permute.xlu0 %v1330_v63 }
 0x157   : > { %v1284_v8 = vpop.eup %1283  ;;  %1293 = vtanh.f32 %v634_v4 }
 0x158   : > { %v651_v9 = vmul.f32 %v1284_v8, %v1277_v3  ;;  %1295 = vtanh.f32 %v637_v12 }
 0x159   : > { %v1286_v11 = vpop.eup %1285  ;;  %1297 = vtanh.f32 %v638_v20 }
 0x15a   : > { %v1288_v14 = vpop.eup %1287  ;;  %v659_v15 = vsel %vm575_vm1, %v651_v9, 0.0  ;;  %v655_v16 = vmul.f32 %v1286_v11, %v1277_v3 }
 0x15b   : > { %v1290_v17 = vpop.eup %1289  ;;  %660 = vadd.xlane.f32.xlu0 %v659_v15  ;;  %v653_v18 = vmul.f32 %v1288_v14, %v1277_v3 }
 0x15c   : > { %v671_v19 = vsel %vm575_vm1, %v655_v16, 0.0  ;;  %v1292_v21 = vpop.eup %1291  ;;  %v652_v24 = vmul.f32 %v1290_v17, %v1277_v3 }
 0x15d   : > { %672 = vadd.xlane.f32.xlu2 %v671_v19  ;;  %v665_v22 = vsel %vm575_vm1, %v653_v18, 0.0  ;;  %v1294_v23 = vpop.eup %1293  ;;  %v656_v25 = vmul.f32 %v1292_v21, %v1277_v3 }
 0x15e   : > { %666 = vadd.xlane.f32.xlu1 %v665_v22  ;;  %v654_v26 = vmul.f32 %v1294_v23, %v1277_v3  ;;  %v662_v27 = vsel %vm575_vm1, %v652_v24, 0.0  ;;  %v1296_v28 = vpop.eup %1295 }
 0x15f   : > { %v674_v29 = vsel %vm575_vm1, %v656_v25, 0.0  ;;  %v1298_v31 = vpop.eup %1297  ;;  %v657_v32 = vmul.f32 %v1296_v28, %v1277_v3 }
 0x160   : > { %v668_v30 = vsel %vm575_vm1, %v654_v26, 0.0  ;;  %v658_v33 = vmul.f32 %v1298_v31, %v1277_v3 }
 0x161   : > { %v677_v34 = vsel %vm575_vm1, %v657_v32, 0.0 }
 0x162   : > { %v680_v35 = vsel %vm575_vm1, %v658_v33, 0.0 }
 0x163   : > { %663 = vadd.xlane.f32.xlu0 %v662_v27 }
 0x165   : > { %675 = vadd.xlane.f32.xlu2 %v674_v29 }
 0x166   : > { %669 = vadd.xlane.f32.xlu1 %v668_v30 }
 0x16b   : > { %678 = vadd.xlane.f32.xlu0 %v677_v34 }
 0x16e   : > { %681 = vadd.xlane.f32.xlu1 %v680_v35 }
 0x1ce   : > { %v661_v36 = vpop.xlane.xlu0 %660 }
 0x1cf   : > { %v693_v43 = vperm.slane %v661_v36, %v1550_v40 }
 0x1d0   : > { %v673_v38 = vpop.xlane.xlu2 %672 }
 0x1d1   : > { %v667_v39 = vpop.xlane.xlu1 %666  ;;  %v697_v50 = vperm.slane %v673_v38, %v1550_v40 }
 0x1d2   : > { %v695_v45 = vperm.slane %v667_v39, %v1550_v40 }
 0x1d6   : > { %v664_v41 = vpop.xlane.xlu0 %663 }
 0x1d7   : > { %v694_v44 = vperm.slane %v664_v41, %v1550_v40 }
 0x1d8   : > { %v676_v51 = vpop.xlane.xlu2 %675 }
 0x1d9   : > { %v702_v46 = vsel %vm701_vm2, %v694_v44, %v693_v43  ;;  %v670_v47 = vpop.xlane.xlu1 %669  ;;  %v698_v54 = vperm.slane %v676_v51, %v1550_v40 }
 0x1da   : > { %v696_v48 = vperm.slane %v670_v47, %v1550_v40  ;;  %v704_v49 = vsel %vm703_vm3, %v695_v45, %v702_v46 }
 0x1dc   : > { %v706_v52 = vsel %vm705_vm4, %v696_v48, %v704_v49 }
 0x1dd   : > { %v708_v53 = vsel %vm707_vm5, %v697_v50, %v706_v52 }
 0x1de   : > { %v679_v55 = vpop.xlane.xlu0 %678  ;;  %v710_v57 = vsel %vm709_vm6, %v698_v54, %v708_v53 }
 0x1df   : > { %v699_v56 = vperm.slane %v679_v55, %v1550_v40 }
 0x1e1   : > { %v682_v58 = vpop.xlane.xlu1 %681  ;;  %v712_v59 = vsel %vm711_vm7, %v699_v56, %v710_v57 }
 0x1e2   : > { %v700_v60 = vperm.slane %v682_v58, %v1550_v40 }
 0x1e4   : > { %v714_v61 = vsel %vm713_vm8, %v700_v60, %v712_v59 }
 0x1e5   : > { %v717_v62 = vsel %vm716_vm9, %v714_v61, -inf }
 0x1e6   : > { %718 = vmax.xlane.f32.xlu2 %v717_v62 }
 0x259   : > { %v719_v0 = vpop.xlane.xlu2 %718 }
 0x25a   : > { %v723_v1 = vperm.slane %v719_v0, 2  ;;  %v722_v2 = vperm.slane %v719_v0, 1  ;;  %v721_v3 = vperm.slane %v719_v0, 0  ;;  %v724_v7 = vperm.slane %v719_v0, 3 }
 0x25b   : > { %v725_v8 = vperm.slane %v719_v0, 4  ;;  %v728_v9 = vperm.slane %v719_v0, 7  ;;  %v726_v17 = vperm.slane %v719_v0, 5  ;;  %v727_v19 = vperm.slane %v719_v0, 6 }
 0x25c   : > { %v739_v4 = vsub.f32 %v667_v39, %v723_v1  ;;  %v738_v5 = vsub.f32 %v664_v41, %v722_v2  ;;  %v737_v6 = vsub.f32 %v661_v36, %v721_v3  ;;  %v740_v13 = vsub.f32 %v670_v47, %v724_v7 }
 0x25d   : > { %v741_v14 = vsub.f32 %v673_v38, %v725_v8  ;;  %v744_v15 = vsub.f32 %v682_v58, %v728_v9  ;;  %v742_v24 = vsub.f32 %v676_v51, %v726_v17  ;;  %v743_v25 = vsub.f32 %v679_v55, %v727_v19  ;;  %v952_v17 = vld [vmem:[%s1820_s7 + $0x50] sm:$0xff]  ;;  %v951_v19 = vld [vmem:[%s1820_s7 + $0x48] sm:$0xff] }
 0x25e   : > { %v749_v10 = vmul.f32 1.442695, %v739_v4  ;;  %v747_v11 = vmul.f32 1.442695, %v738_v5  ;;  %v745_v12 = vmul.f32 1.442695, %v737_v6 }
 0x25f   : > { %v751_v16 = vmul.f32 1.442695, %v740_v13  ;;  %v753_v18 = vmul.f32 1.442695, %v741_v14  ;;  %v759_v21 = vmul.f32 1.442695, %v744_v15 }
 0x260   : > { %1299 = vpow2.f32 %v749_v10  ;;  %v755_v26 = vmul.f32 1.442695, %v742_v24  ;;  %v757_v27 = vmul.f32 1.442695, %v743_v25  ;;  %v956_v13 = vld [vmem:[%s1820_s7 + $0x70] sm:$0xff]  ;;  %v955_v14 = vld [vmem:[%s1820_s7 + $0x68] sm:$0xff] }
 0x261   : > { %1301 = vpow2.f32 %v747_v11  ;;  %v954_v15 = vld [vmem:[%s1820_s7 + $0x60] sm:$0xff]  ;;  %v949_v25 = vld [vmem:[%s1820_s7 + $0x38] sm:$0xff] }
 0x262   : > { %1303 = vpow2.f32 %v745_v12  ;;  %v957_v12 = vld [vmem:[%s1820_s7 + $0x78] sm:$0xff]  ;;  %v555_v24 = vld [vmem:[%s1813_s0] sm:$0xff] }
 0x263   : > { %1305 = vpow2.f32 %v751_v16  ;;  %974 = vmatpush.msra.mxu1 %v957_v12  ;;  %v953_v16 = vld [vmem:[%s1820_s7 + $0x58] sm:$0xff] }
 0x264   : > { %1307 = vpow2.f32 %v753_v18  ;;  %v941_v18 = vld [vmem:[%s1819_s6 + $0x38] sm:$0xff] }
 0x265   : > { %1309 = vpow2.f32 %v759_v21  ;;  %975 = vmatpush.msra.mxu1 %v956_v13  ;;  %1005 = vmatpush.msra.mxu3 %v941_v18  ;;  %v950_v21 = vld [vmem:[%s1820_s7 + $0x40] sm:$0xff]  ;;  %v561_v18 = vld [vmem:[%s1813_s0 + $0x30] sm:$0xff] }
 0x266   : > { %v1568_v20 = vpop.eup %1299  ;;  %1311 = vpow2.f32 %v755_v26  ;;  %v938_v26 = vld [vmem:[%s1819_s6 + $0x20] sm:$0xff] }
 0x267   : > { %v1302_v22 = vpop.eup %1301  ;;  %776 = vperm.xlu2 %1276, %v1568_v20   ;;  %1313 = vpow2.f32 %v757_v27  ;;  %976 = vmatpush.msra.mxu1 %v955_v14 }
 0x268   : > { %v1304_v23 = vpop.eup %1303  ;;  %773 = vperm.xlu1 %1275, %v1302_v22  }
 0x269   : > { %770 = vperm.xlu0 %1274, %v1304_v23   ;;  %v1306_v28 = vpop.eup %1305  ;;  %977 = vmatpush.msra.mxu1 %v954_v15 }
 0x26a   : > { %v1308_v29 = vpop.eup %1307 }
 0x26b   : > { %v1310_v30 = vpop.eup %1309  ;;  %978 = vmatpush.msra.mxu1 %v953_v16 }
 0x26c   : > { %v1312_v31 = vpop.eup %1311 }
 0x26d   : > { %v1314_v32 = vpop.eup %1313  ;;  %979 = vmatpush.msra.mxu1 %v952_v17  ;;  %v562_v17 = vld [vmem:[%s1813_s0 + $0x38] sm:$0xff] }
 0x26f   : > { %779 = vperm.xlu2 %1276, %v1306_v28   ;;  %980 = vmatpush.msra.mxu1 %v951_v19 }
 0x270   : > { %782 = vperm.xlu1 %1275, %v1308_v29  }
 0x271   : > { %791 = vperm.xlu0 %1274, %v1310_v30   ;;  %981 = vmatpush.msra.mxu1 %v950_v21 }
 0x273   : > { %982 = vmatpush.msra.mxu1 %v949_v25 }
 0x277   : > { %785 = vperm.xlu2 %1276, %v1312_v31  }
 0x278   : > { %788 = vperm.xlu1 %1275, %v1314_v32  }
 0x2c1   : > { %v777_v33 = vpop.permute.xlu2 %776 }
 0x2c2   : > { %v795_v43 = vperm.slane %v777_v33, %v1550_v40  ;;  %v947_v33 = vld [vmem:[%s1820_s7 + $0x28] sm:$0xff] }
 0x2c9   : > { %v780_v36 = vpop.permute.xlu2 %779 }
 0x2ca   : > { %v796_v46 = vperm.slane %v780_v36, %v1550_v40  ;;  %v946_v36 = vld [vmem:[%s1820_s7 + $0x20] sm:$0xff] }
 0x2d1   : > { %v786_v47 = vpop.permute.xlu2 %785 }
 0x2d2   : > { %v798_v51 = vperm.slane %v786_v47, %v1550_v40 }
 0x2da   : > { %v774_v34 = vpop.permute.xlu1 %773 }
 0x2db   : > { %v771_v35 = vpop.permute.xlu0 %770  ;;  %v794_v37 = vperm.slane %v774_v34, %v1550_v40  ;;  %v936_v34 = vld [vmem:[%s1819_s6 + $0x10] sm:$0xff] }
 0x2dc   : > { %v793_v38 = vperm.slane %v771_v35, %v1550_v40  ;;  %v558_v35 = vld [vmem:[%s1813_s0 + $0x18] sm:$0xff] }
 0x2de   : > { %v801_v39 = vsel %vm701_vm2, %v794_v37, %v793_v38  ;;  %v935_v37 = vld [vmem:[%s1819_s6 + $0x8] sm:$0xff]  ;;  %v945_v38 = vld [vmem:[%s1820_s7 + $0x18] sm:$0xff] }
 0x2df   : > { %v802_v44 = vsel %vm703_vm3, %v795_v43, %v801_v39  ;;  %v557_v43 = vld [vmem:[%s1813_s0 + $0x10] sm:$0xff] }
 0x2e0   : > { %v803_v48 = vsel %vm705_vm4, %v796_v46, %v802_v44  ;;  %v934_v44 = vld [vmem:[%s1819_s6] sm:$0xff]  ;;  %v944_v46 = vld [vmem:[%s1820_s7 + $0x10] sm:$0xff] }
 0x2e2   : > { %v783_v41 = vpop.permute.xlu1 %782 }
 0x2e3   : > { %v797_v45 = vperm.slane %v783_v41, %v1550_v40  ;;  %v792_v50 = vpop.permute.xlu0 %791 }
 0x2e4   : > { %v800_v54 = vperm.slane %v792_v50, %v1550_v40 }
 0x2e5   : > { %v804_v49 = vsel %vm707_vm5, %v797_v45, %v803_v48  ;;  %v563_v45 = vld [vmem:[#allocation3] sm:$0xff] }
 0x2e6   : > { %v805_v55 = vsel %vm709_vm6, %v798_v51, %v804_v49  ;;  %v943_v51 = vld [vmem:[%s1820_s7 + $0x8] sm:$0xff] }
 0x2ea   : > { %v789_v52 = vpop.permute.xlu1 %788 }
 0x2eb   : > { %v799_v53 = vperm.slane %v789_v52, %v1550_v40  ;;  %v1036_v52 = vld [vmem:[%s1823_s10 + $0x38] sm:$0xff] }
 0x2ed   : > { %v806_v56 = vsel %vm711_vm7, %v799_v53, %v805_v55  ;;  %v1035_v53 = vld [vmem:[%s1823_s10 + $0x30] sm:$0xff] }
 0x2ee   : > { %v807_v57 = vsel %vm713_vm8, %v800_v54, %v806_v56 }
 0x2ef   : > { %v809_v58 = vsel %vm716_vm9, %v807_v57, 0.0 }
 0x2f0   : > { %810 = vadd.xlane.f32.xlu2 %v809_v58  ;;  %v942_v58 = vld [vmem:[%s1820_s7] sm:$0xff] }
 0x363   : > { %v811_v59 = vpop.xlane.xlu2 %810 }
 0x364   : > { %1315 = vrcp.f32 %v811_v59  ;;  %v1034_v59 = vld [vmem:[%s1823_s10 + $0x28] sm:$0xff] }
 0x36a   : > { %v1316_v60 = vpop.eup %1315 }
 0x36b   : > { %v815_v61 = vperm.slane %v1316_v60, 1  ;;  %v814_v62 = vperm.slane %v1316_v60, 0  ;;  %v817_v1 = vperm.slane %v1316_v60, 3  ;;  %v816_v40 = vperm.slane %v1316_v60, 2 }
 0x36c   : > { %v819_v4 = vperm.slane %v1316_v60, 5  ;;  %v818_v5 = vperm.slane %v1316_v60, 4  ;;  %v821_v8 = vperm.slane %v1316_v60, 7  ;;  %v820_v9 = vperm.slane %v1316_v60, 6 }
 0x36d   : > { %v831_v63 = vmul.f32 %v1302_v22, %v815_v61  ;;  %v830_v0 = vmul.f32 %v1304_v23, %v814_v62  ;;  %v833_v2 = vmul.f32 %v1306_v28, %v817_v1  ;;  %v832_v3 = vmul.f32 %v1568_v20, %v816_v40  ;;  %v940_v20 = vld [vmem:[%s1819_s6 + $0x30] sm:$0xff]  ;;  %v939_v22 = vld [vmem:[%s1819_s6 + $0x28] sm:$0xff]  ;;  %v559_v1 = vld [vmem:[%s1813_s0 + $0x20] sm:$0xff] }
 0x36e   : > { %v835_v6 = vmul.f32 %v1312_v31, %v819_v4  ;;  %v834_v7 = vmul.f32 %v1308_v29, %v818_v5  ;;  %v837_v10 = vmul.f32 %v1310_v30, %v821_v8  ;;  %v836_v11 = vmul.f32 %v1314_v32, %v820_v9  ;;  %1006 = vmatpush.msra.mxu3 %v940_v20  ;;  %v556_v23 = vld [vmem:[%s1813_s0 + $0x8] sm:$0xff]  ;;  %v948_v29 = vld [vmem:[%s1820_s7 + $0x30] sm:$0xff]  ;;  %v937_v30 = vld [vmem:[%s1819_s6 + $0x18] sm:$0xff] }
 0x36f   : > { %845 = vperm.xlu0 %1274, %v831_v63   ;;  %840 = vperm.xlu1 %1275, %v830_v0   ;;  %v560_v0 = vld [vmem:[%s1813_s0 + $0x28] sm:$0xff] }
 0x370   : > { %1007 = vmatpush.msra.mxu3 %v939_v22  ;;  %983 = vmatpush.msra.mxu1 %v948_v29 }
 0x372   : > { %1008 = vmatpush.msra.mxu3 %v938_v26  ;;  %984 = vmatpush.msra.mxu1 %v947_v33 }
 0x374   : > { %1009 = vmatpush.msra.mxu3 %v937_v30  ;;  %985 = vmatpush.msra.mxu1 %v946_v36 }
 0x376   : > { %1010 = vmatpush.msra.mxu3 %v936_v34  ;;  %986 = vmatpush.msra.mxu1 %v945_v38 }
 0x377   : > { %855 = vperm.xlu0 %1274, %v833_v2   ;;  %850 = vperm.xlu1 %1275, %v832_v3  }
 0x378   : > { %1011 = vmatpush.msra.mxu3 %v935_v37  ;;  %987 = vmatpush.msra.mxu1 %v944_v46 }
 0x37a   : > { %1012 = vmatpush.msra.mxu3 %v934_v44  ;;  %988 = vmatpush.msra.mxu1 %v943_v51 }
 0x37b   : > { %1208 = vmatmul.msk.f32.vlgmr.msra.gmra.mxu3 %vm575_vm1, %v563_v45 }
 0x37c   : > { %1053 = vmatpush.msrb.mxu3 %v1036_v52  ;;  %989 = vmatpush.msra.mxu1 %v942_v58  ;;  %v1033_v58 = vld [vmem:[%s1823_s10 + $0x20] sm:$0xff] }
 0x37e   : > { %1054 = vmatpush.msrb.mxu3 %v1035_v53 }
 0x37f   : > { %865 = vperm.xlu0 %1274, %v835_v6   ;;  %860 = vperm.xlu1 %1275, %v834_v7  }
 0x380   : > { %1055 = vmatpush.msrb.mxu3 %v1034_v59  ;;  %v1032_v59 = vld [vmem:[%s1823_s10 + $0x18] sm:$0xff] }
 0x382   : > { %1056 = vmatpush.msrb.mxu3 %v1033_v58 }
 0x384   : > { %1057 = vmatpush.msrb.mxu3 %v1032_v59 }
 0x387   : > { %875 = vperm.xlu0 %1274, %v837_v10   ;;  %870 = vperm.xlu1 %1275, %v836_v11  }
 0x3e1   : > { %v846_v27 = vpop.permute.xlu0 %845  ;;  %v841_v28 = vpop.permute.xlu1 %840 }
 0x3e2   : > { %v879_v31 = vmul.f32 %v846_v27, %v556_v23  ;;  %v878_v32 = vmul.f32 %v841_v28, %v555_v24 }
 0x3e4   : > { %v892_v39 = vrot.slane %v879_v31, 4  ;;  %v886_v41 = vrot.slane %v878_v32, 4 }
 0x3e6   : > { %v893_v54 = vadd.f32 %v892_v39, %v879_v31  ;;  %v887_v55 = vadd.f32 %v886_v41, %v878_v32 }
 0x3e8   : > { %v894_v61 = vrot.slane %v893_v54, 2  ;;  %v888_v62 = vrot.slane %v887_v55, 2 }
 0x3e9   : > { %v856_v47 = vpop.permute.xlu0 %855  ;;  %v851_v48 = vpop.permute.xlu1 %850 }
 0x3ea   : > { %v881_v49 = vmul.f32 %v856_v47, %v558_v35  ;;  %v880_v50 = vmul.f32 %v851_v48, %v557_v43  ;;  %v895_v6 = vadd.f32 %v894_v61, %v893_v54  ;;  %v889_v7 = vadd.f32 %v888_v62, %v887_v55  ;;  %v1030_v61 = vld [vmem:[%s1823_s10 + $0x8] sm:$0xff]  ;;  %v1078_v62 = vld [vmem:[%s1826_s13 + $0x38] sm:$0xff] }
 0x3eb   : > { %1094 = vmatpush.msrb.mxu0 %v1078_v62 }
 0x3ec   : > { %v904_v56 = vrot.slane %v881_v49, 4  ;;  %v898_v57 = vrot.slane %v880_v50, 4  ;;  %v896_v14 = vrot.slane %v895_v6, 1  ;;  %v890_v15 = vrot.slane %v889_v7, 1 }
 0x3ee   : > { %v899_v60 = vadd.f32 %v898_v57, %v880_v50  ;;  %v905_v63 = vadd.f32 %v904_v56, %v881_v49  ;;  %v897_v27 = vadd.f32 %v896_v14, %v895_v6  ;;  %v891_v28 = vadd.f32 %v890_v15, %v889_v7  ;;  %v1072_v14 = vld [vmem:[%s1826_s13 + $0x8] sm:$0xff]  ;;  %v1071_v15 = vld [vmem:[%s1826_s13] sm:$0xff] }
 0x3f0   : > { %v900_v40 = vrot.slane %v899_v60, 2  ;;  %v906_v8 = vrot.slane %v905_v63, 2  ;;  %v966_v37 = vsel %vm701_vm2, %v897_v27, %v891_v28  ;;  %v1131_v27 = vld [vmem:[%s1815_s2 + $0x50] sm:$0xff]  ;;  %v1130_v28 = vld [vmem:[%s1815_s2 + $0x48] sm:$0xff] }
 0x3f1   : > { %v866_v2 = vpop.permute.xlu0 %865  ;;  %v861_v3 = vpop.permute.xlu1 %860 }
 0x3f2   : > { %v883_v4 = vmul.f32 %v866_v2, %v560_v0  ;;  %v882_v5 = vmul.f32 %v861_v3, %v559_v1  ;;  %v901_v9 = vadd.f32 %v900_v40, %v899_v60  ;;  %v907_v16 = vadd.f32 %v906_v8, %v905_v63  ;;  %v1031_v60 = vld [vmem:[%s1823_s10 + $0x10] sm:$0xff]  ;;  %v1029_v0 = vld [vmem:[%s1823_s10] sm:$0xff]  ;;  %v1076_v1 = vld [vmem:[%s1826_s13 + $0x28] sm:$0xff] }
 0x3f3   : > { %1058 = vmatpush.msrb.mxu3 %v1031_v60  ;;  %v1077_v63 = vld [vmem:[%s1826_s13 + $0x30] sm:$0xff]  ;;  %v1075_v40 = vld [vmem:[%s1826_s13 + $0x20] sm:$0xff] }
 0x3f4   : > { %v916_v10 = vrot.slane %v883_v4, 4  ;;  %v910_v11 = vrot.slane %v882_v5, 4  ;;  %v902_v19 = vrot.slane %v901_v9, 1  ;;  %v908_v29 = vrot.slane %v907_v16, 1  ;;  %1095 = vmatpush.msrb.mxu0 %v1077_v63  ;;  %v1278_v2 = vld [vmem:[%s1821_s8] ss:$0 sm:$0xff] }
 0x3f5   : > { %1059 = vmatpush.msrb.mxu3 %v1030_v61  ;;  %v564_v3 = vld [vmem:[#allocation2] sm:$0xff] }
 0x3f6   : > { %v917_v12 = vadd.f32 %v916_v10, %v883_v4  ;;  %v911_v13 = vadd.f32 %v910_v11, %v882_v5  ;;  %v903_v31 = vadd.f32 %v902_v19, %v901_v9  ;;  %v909_v38 = vadd.f32 %v908_v29, %v907_v16  ;;  %1096 = vmatpush.msrb.mxu0 %v1076_v1  ;;  %v1279_v8 = vld [vmem:[%s1822_s9] ss:$0 sm:$0xff] }
 0x3f7   : > { %1060 = vmatpush.msrb.mxu3 %v1029_v0  ;;  %v1021_v5 = vmul.f32 %v1278_v2, %v564_v3  ;;  %v1280_v16 = vld [vmem:[%s1824_s11] ss:$0 sm:$0xff] }
 0x3f8   : > { %v918_v20 = vrot.slane %v917_v12, 2  ;;  %v912_v21 = vrot.slane %v911_v13, 2  ;;  %v967_v41 = vsel %vm703_vm3, %v903_v31, %v966_v37  ;;  %1097 = vmatpush.msrb.mxu0 %v1075_v40  ;;  %v1129_v29 = vld [vmem:[%s1815_s2 + $0x40] sm:$0xff]  ;;  %v1127_v31 = vld [vmem:[%s1815_s2 + $0x30] sm:$0xff]  ;;  %v1122_v37 = vld [vmem:[%s1815_s2 + $0x8] sm:$0xff] }
 0x3f9   : > { %v876_v22 = vpop.permute.xlu0 %875  ;;  %v871_v23 = vpop.permute.xlu1 %870  ;;  %v968_v49 = vsel %vm705_vm4, %v909_v38, %v967_v41  ;;  %v1121_v41 = vld [vmem:[%s1815_s2] sm:$0xff] }
 0x3fa   : > { %v913_v24 = vadd.f32 %v912_v21, %v911_v13  ;;  %v885_v25 = vmul.f32 %v876_v22, %v562_v17  ;;  %v884_v26 = vmul.f32 %v871_v23, %v561_v18  ;;  %v919_v30 = vadd.f32 %v918_v20, %v917_v12  ;;  %v1074_v12 = vld [vmem:[%s1826_s13 + $0x18] sm:$0xff]  ;;  %v1073_v13 = vld [vmem:[%s1826_s13 + $0x10] sm:$0xff]  ;;  %v1281_v18 = vld [vmem:[%s1825_s12] ss:$0 sm:$0xff] }
 0x3fb   : > { %1098 = vmatpush.msrb.mxu0 %v1074_v12  ;;  %v1041_v17 = vmul.f32 %v1280_v16, %v1535_v42  ;;  %v1136_v23 = vld [vmem:[%s1815_s2 + $0x78] sm:$0xff]  ;;  %v1135_v42 = vld [vmem:[%s1815_s2 + $0x70] sm:$0xff] }
 0x3fc   : > { %v914_v32 = vrot.slane %v913_v24, 1  ;;  %v928_v33 = vrot.slane %v885_v25, 4  ;;  %v922_v34 = vrot.slane %v884_v26, 4  ;;  %v920_v39 = vrot.slane %v919_v30, 1  ;;  %1137 = vmatpush.msra.mxu2 %v1136_v23 }
 0x3fd   : > { %1099 = vmatpush.msrb.mxu0 %v1073_v13 }
 0x3fe   : > { %v929_v35 = vadd.f32 %v928_v33, %v885_v25  ;;  %v923_v36 = vadd.f32 %v922_v34, %v884_v26  ;;  %v915_v43 = vadd.f32 %v914_v32, %v913_v24  ;;  %v921_v48 = vadd.f32 %v920_v39, %v919_v30  ;;  %v1014_v4 = vpop.f32.mrf.mxu3  ;;  %v1134_v24 = vld [vmem:[%s1815_s2 + $0x68] sm:$0xff]  ;;  %1138 = vmatpush.msra.mxu2 %v1135_v42  ;;  %v1133_v25 = vld [vmem:[%s1815_s2 + $0x60] sm:$0xff]  ;;  %v1132_v26 = vld [vmem:[%s1815_s2 + $0x58] sm:$0xff] }
 0x3ff   : > { %1100 = vmatpush.msrb.mxu0 %v1072_v14  ;;  %v1128_v30 = vld [vmem:[%s1815_s2 + $0x38] sm:$0xff]  ;;  %v1126_v32 = vld [vmem:[%s1815_s2 + $0x28] sm:$0xff]  ;;  %v1125_v33 = vld [vmem:[%s1815_s2 + $0x20] sm:$0xff] }
 0x400   : > { %v930_v44 = vrot.slane %v929_v35, 2  ;;  %v924_v45 = vrot.slane %v923_v36, 2  ;;  %v969_v52 = vsel %vm707_vm5, %v915_v43, %v968_v49  ;;  %1139 = vmatpush.msra.mxu2 %v1134_v24  ;;  %v1124_v34 = vld [vmem:[%s1815_s2 + $0x18] sm:$0xff] }
 0x401   : > { %v970_v55 = vsel %vm709_vm6, %v921_v48, %v969_v52  ;;  %1101 = vmatpush.msrb.mxu0 %v1071_v15 }
 0x402   : > { %v931_v46 = vadd.f32 %v930_v44, %v929_v35  ;;  %v925_v47 = vadd.f32 %v924_v45, %v923_v36  ;;  %1140 = vmatpush.msra.mxu2 %v1133_v25  ;;  %v1123_v35 = vld [vmem:[%s1815_s2 + $0x10] sm:$0xff]  ;;  %v1282_v36 = vld [vmem:[%s1827_s14] ss:$0 sm:$0xff]  ;;  %v1331_v45 = vmov 1.0  }
 0x404   : > { %v932_v50 = vrot.slane %v931_v46, 1  ;;  %v926_v51 = vrot.slane %v925_v47, 1  ;;  %1141 = vmatpush.msra.mxu2 %v1132_v26 }
 0x406   : > { %v927_v53 = vadd.f32 %v926_v51, %v925_v47  ;;  %v933_v54 = vadd.f32 %v932_v50, %v931_v46  ;;  %1142 = vmatpush.msra.mxu2 %v1131_v27 }
 0x408   : > { %v971_v56 = vsel %vm711_vm7, %v927_v53, %v970_v55  ;;  %1143 = vmatpush.msra.mxu2 %v1130_v28 }
 0x409   : > { %v972_v57 = vsel %vm713_vm8, %v933_v54, %v971_v56 }
 0x40a   : > { %990 = vmatmul.f32.vlgmr.msra.gmra.mxu1 %v972_v57  ;;  %1144 = vmatpush.msra.mxu2 %v1129_v29 }
 0x40c   : > { %1145 = vmatpush.msra.mxu2 %v1128_v30 }
 0x40e   : > { %1146 = vmatpush.msra.mxu2 %v1127_v31 }
 0x410   : > { %1147 = vmatpush.msra.mxu2 %v1126_v32 }
 0x412   : > { %1148 = vmatpush.msra.mxu2 %v1125_v33 }
 0x414   : > { %1149 = vmatpush.msra.mxu2 %v1124_v34 }
 0x416   : > { %1150 = vmatpush.msra.mxu2 %v1123_v35 }
 0x418   : > { %1151 = vmatpush.msra.mxu2 %v1122_v37 }
 0x41a   : > { %1152 = vmatpush.msra.mxu2 %v1121_v41 }
 0x487   : > { %v991_v6 = vpop.f32.mrf.mxu1 }
 0x488   : > { %v1015_v7 = vadd.f32 %v1014_v4, %v991_v6 }
 0x48a   : > { %v1022_v9 = vadd.f32 %v1021_v5, %v1015_v7 }
 0x48c   : > { %v1027_v10 = vadd.f32 %v1279_v8, %v1022_v9 }
 0x48e   : > { %v1028_v11 = vmax.f32 %v1027_v10, 0.0 }
 0x490   : > { %1158 = vst.msk [vmem:[#allocation2] sm:$0xff] %vm575_vm1, %v1028_v11  ;;  %1209 = vmatmul.msk.f32.vlgmr.msrb.gmra.mxu3 %vm575_vm1, %v1028_v11 }
 0x513   : > { %v1062_v19 = vpop.f32.mrf.mxu3 }
 0x514   : > { %v1063_v20 = vadd.f32 %v1062_v19, %v1041_v17 }
 0x516   : > { %v1069_v21 = vadd.f32 %v1281_v18, %v1063_v20 }
 0x518   : > { %v1070_v22 = vmax.f32 %v1069_v21, 0.0 }
 0x51a   : > { %1159 = vst.msk [vmem:[#allocation2 + $0x8] sm:$0xff] %vm575_vm1, %v1070_v22  ;;  %1210 = vmatmul.msk.f32.vlgmr.msrb.gmra.mxu0 %vm575_vm1, %v1070_v22 }
 0x597   : > { %v1103_v38 = vpop.f32.mrf.mxu0 }
 0x598   : > { %v1104_v39 = vadd.f32 %v1282_v36, %v1103_v38 }
 0x59a   : > { %1106 = vmax.xlane.f32.xlu1 %v1104_v39 }
 0x60d   : > { %v1107_v43 = vpop.xlane.xlu1 %1106 }
 0x60e   : > { %v1108_v44 = vsub.f32 %v1104_v39, %v1107_v43  ;;  %vm1118_vm10 = vcmp.eq.f32.partialorder %v1104_v39, %v1107_v43 }
 0x60f   : > { %1212 = vmatmul.msk.f32.vlgmr.msra.gmra.mxu2 %vm1118_vm10, %v1331_v45 }
 0x610   : > { %v1109_v46 = vmul.f32 1.442695, %v1108_v44 }
 0x612   : > { %1317 = vpow2.f32 %v1109_v46 }
 0x618   : > { %v1318_v47 = vpop.eup %1317 }
 0x619   : > { %1111 = vadd.xlane.f32.xlu0 %v1318_v47 }
 0x68c   : > { %v1112_v48 = vpop.xlane.xlu0 %1111 }
 0x68d   : > { %1319 = vlog2.f32 %v1112_v48 }
 0x692   : > { %v1154_v49 = vpop.f32.mrf.mxu2 }
 0x693   : > { %v1320_v50 = vpop.eup %1319  ;;  %1157 = vst.msk [vmem:[#allocation3] sm:$0xff] %vm575_vm1, %v1154_v49 }
 0x694   : > { %v1114_v51 = vmul.f32 0.6931472, %v1320_v50 }
 0x696   : > { %v1115_v52 = vadd.f32 %v1114_v51, %v1107_v43 }
 0x698   : > { %v1116_v53 = vsub.f32 %v1104_v39, %v1115_v52 }
 0x69a   : > { %1117 = vst [vmem:[%s1423_s24] sm:$0xff] %v1116_v53 }
 0x69b PF: > { %s25_s18 = sadd.s32 1, %s1327_s18  }
 0x69c   : > { %p22_p5 = scmp.ge.s32.totalorder %s25_s18, 11  }
 0x69e   :  { %24 = sbr.rel (!%p22_p5) target bundleno = 1 (0x1), region = 112 }

</bundles_post_ra>
